<compile_context>
chip_gen: v5e
topology: v5e:2x2
jax: 0.10.0
libtpu: 0.0.40
codegen_flags: <defaults>
</compile_context>

<pallas_src>
import functools

import jax
import jax.numpy as jnp
from jax import lax
from jax.experimental import pallas as pl
from jax.experimental.pallas import tpu as pltpu


def _fused_mlp_kernel(*refs, num_stacked: int):
    """Fused MLP forward.

    refs (when num_stacked > 0):
      x_ref      (bm, n_inputs)
      w_in_ref   (n_inputs, n_nodes)            weights pre-transposed (In, Out)
      b_in_ref   (1, n_nodes)
      w_hid_ref  (num_stacked, n_nodes, n_nodes) stacked hidden layers
      b_hid_ref  (num_stacked, 1, n_nodes)
      w_out_ref  (n_nodes, padded_out)          zero-padded to a lane multiple
      b_out_ref  (1, padded_out)
      o_ref      (bm, padded_out)
    """
    if num_stacked > 0:
        (x_ref, w_in_ref, b_in_ref, w_hid_ref, b_hid_ref,
         w_out_ref, b_out_ref, o_ref) = refs
    else:
        x_ref, w_in_ref, b_in_ref, w_out_ref, b_out_ref, o_ref = refs

    # First hidden layer: relu(x @ w + b), f32 accumulation on the MXU.
    h = jnp.dot(x_ref[...], w_in_ref[...], preferred_element_type=jnp.float32)
    h = jnp.maximum(h + b_in_ref[...], 0.0)

    # Remaining hidden layers: walk the stacked weight tensor; the running
    # activation stays on-chip, one layer's weight slice addressed per step.
    if num_stacked > 0:
        def body(i, h):
            w = w_hid_ref[i]          # (n_nodes, n_nodes)
            b = b_hid_ref[i]          # (1, n_nodes)
            h = jnp.dot(h, w, preferred_element_type=jnp.float32)
            return jnp.maximum(h + b, 0.0)

        h = lax.fori_loop(0, num_stacked, body, h, unroll=num_stacked <= 8)

    # Output layer (no ReLU); lane-dense padded store.
    y = jnp.dot(h, w_out_ref[...], preferred_element_type=jnp.float32)
    o_ref[...] = (y + b_out_ref[...]).astype(o_ref.dtype)


def torch_model_forward(params, x, n_outputs):
    """Forward pass identical to TorchModel.forward, as ONE fused Pallas kernel.

    params: dict from init_torch_model_params (already in kernel layout).
    x: (batch, n_inputs). n_outputs: static Python int (padded columns sliced off).
    """
    batch, n_inputs = x.shape
    w_in, b_in = params["w_in"], params["b_in"]
    w_out, b_out = params["w_out"], params["b_out"]
    padded_out = w_out.shape[1]
    num_stacked = params["w_hid"].shape[0] if "w_hid" in params else 0

    # Batch tiling: one whole-batch block at small sizes; 128-row tiles on a
    # "parallel" grid axis at realistic batch so v7x's 2 TCs share the work.
    bm = 128 if (batch >= 256 and batch % 128 == 0) else batch
    grid = (batch // bm,)

    def full(shape):
        # Whole-array block, constant block index regardless of grid step
        # (Pallas skips re-DMA when the block index is unchanged).
        return pl.BlockSpec(shape, lambda i: (0,) * len(shape))

    inputs = [x, w_in, b_in]
    in_specs = [pl.BlockSpec((bm, n_inputs), lambda i: (i, 0)),
                full(w_in.shape), full(b_in.shape)]
    if num_stacked > 0:
        inputs += [params["w_hid"], params["b_hid"]]
        in_specs += [full(params["w_hid"].shape), full(params["b_hid"].shape)]
    inputs += [w_out, b_out]
    in_specs += [full(w_out.shape), full(b_out.shape)]

    kernel = functools.partial(_fused_mlp_kernel, num_stacked=num_stacked)
    out_padded = pl.pallas_call(
        kernel,
        grid=grid,
        out_shape=jax.ShapeDtypeStruct((batch, padded_out), x.dtype),
        in_specs=in_specs,
        out_specs=pl.BlockSpec((bm, padded_out), lambda i: (i, 0)),
        compiler_params=pltpu.CompilerParams(
            dimension_semantics=("parallel",)),
    )(*inputs)
    return out_padded[:, :n_outputs]


def init_torch_model_params(key, n_inputs, n_outputs, n_layer, n_nodes):
    """nn.Linear-style init (U(-1/sqrt(fan_in), +1/sqrt(fan_in))), stored ONCE
    in kernel-friendly layout: (In, Out) weights, stacked hidden layers, and a
    zero-padded (lane-dense) output layer.
    """
    def linear(k, fan_in, fan_out):
        kw, kb = jax.random.split(k)
        bound = 1.0 / (float(fan_in) ** 0.5)
        w = jax.random.uniform(kw, (fan_in, fan_out), jnp.float32, -bound, bound)
        b = jax.random.uniform(kb, (1, fan_out), jnp.float32, -bound, bound)
        return w, b

    keys = jax.random.split(key, n_layer + 1)
    params = {}
    params["w_in"], params["b_in"] = linear(keys[0], n_inputs, n_nodes)

    if n_layer > 1:
        ws, bs = [], []
        for i in range(1, n_layer):
            w, b = linear(keys[i], n_nodes, n_nodes)
            ws.append(w)
            bs.append(b)
        params["w_hid"] = jnp.stack(ws)   # (n_layer-1, n_nodes, n_nodes)
        params["b_hid"] = jnp.stack(bs)   # (n_layer-1, 1, n_nodes)

    w_out, b_out = linear(keys[n_layer], n_nodes, n_outputs)
    padded_out = ((n_outputs + 127) // 128) * 128
    params["w_out"] = jnp.pad(w_out, ((0, 0), (0, padded_out - n_outputs)))
    params["b_out"] = jnp.pad(b_out, ((0, 0), (0, padded_out - n_outputs)))
    return params


if __name__ == "__main__":
    # Small, forward-consistent sizes (nInputs=32, nOutputs=8, nLayer=3, nNodes=32).
    n_inputs, n_outputs, n_layer, n_nodes = 32, 8, 3, 32
    batch = 8

    key = jax.random.PRNGKey(0)
    key, kx = jax.random.split(key)
    x = jax.random.normal(kx, (batch, n_inputs), jnp.float32)

    params = init_torch_model_params(key, n_inputs, n_outputs, n_layer, n_nodes)

    fwd = jax.jit(functools.partial(torch_model_forward, n_outputs=n_outputs))
    out = jax.block_until_ready(fwd(params, x))

    # Pure-JAX reference of the same math (PyTorch: relu(Linear) x nLayer, Linear).
    ref = jnp.maximum(x @ params["w_in"] + params["b_in"], 0.0)
    if "w_hid" in params:
        for i in range(params["w_hid"].shape[0]):
            ref = jnp.maximum(ref @ params["w_hid"][i] + params["b_hid"][i], 0.0)
    ref = (ref @ params["w_out"] + params["b_out"])[:, :n_outputs]

    assert out.shape == (batch, n_outputs)
    assert jnp.allclose(out, ref, atol=1e-5, rtol=1e-5)
    print("KERNEL_OK")
</pallas_src>

<mosaic_0001>
module attributes {stable_mosaic.version = 11 : i64} {
  func.func @_fused_mlp_kernel(%arg0: i32, %arg1: memref<8x32xf32, #tpu.memory_space<vmem>>, %arg2: memref<32x32xf32, #tpu.memory_space<vmem>>, %arg3: memref<1x32xf32, #tpu.memory_space<vmem>>, %arg4: memref<2x32x32xf32, #tpu.memory_space<vmem>>, %arg5: memref<2x1x32xf32, #tpu.memory_space<vmem>>, %arg6: memref<32x128xf32, #tpu.memory_space<vmem>>, %arg7: memref<1x128xf32, #tpu.memory_space<vmem>>, %arg8: memref<8x128xf32, #tpu.memory_space<vmem>>) attributes {dimension_semantics = [#tpu.dimension_semantics<parallel>], iteration_bounds = array<i64: 1>, scalar_prefetch = 0 : i64, scratch_operands = 0 : i64, tpu.core_type = #tpu.core_type<tc>, window_params = [{transform_indices = @transform_0, window_bounds = array<i64: 8, 32>}, {pipeline_mode = #tpu.pipeline_mode<synchronous>, transform_indices = @transform_1, window_bounds = array<i64: 32, 32>}, {pipeline_mode = #tpu.pipeline_mode<synchronous>, transform_indices = @transform_2, window_bounds = array<i64: 1, 32>}, {pipeline_mode = #tpu.pipeline_mode<synchronous>, transform_indices = @transform_3, window_bounds = array<i64: 2, 32, 32>}, {pipeline_mode = #tpu.pipeline_mode<synchronous>, transform_indices = @transform_4, window_bounds = array<i64: 2, 1, 32>}, {pipeline_mode = #tpu.pipeline_mode<synchronous>, transform_indices = @transform_5, window_bounds = array<i64: 32, 128>}, {pipeline_mode = #tpu.pipeline_mode<synchronous>, transform_indices = @transform_6, window_bounds = array<i64: 1, 128>}, {transform_indices = @transform_7, window_bounds = array<i64: 8, 128>}]} {
    %c0 = arith.constant 0 : index
    %c0_0 = arith.constant 0 : index
    %0 = vector.load %arg1[%c0, %c0_0] : memref<8x32xf32, #tpu.memory_space<vmem>>, vector<8x32xf32>
    %c0_1 = arith.constant 0 : index
    %c0_2 = arith.constant 0 : index
    %1 = vector.load %arg2[%c0_1, %c0_2] : memref<32x32xf32, #tpu.memory_space<vmem>>, vector<32x32xf32>
    %cst = arith.constant dense<0.000000e+00> : vector<8x32xf32>
    %2 = tpu.matmul %0, %1, %cst {dimension_numbers = #tpu.dot_dimension_numbers<[1], [0], [0], [1], [0, 0, 1, 1], [], []>} : vector<8x32xf32>, vector<32x32xf32>, vector<8x32xf32> -> vector<8x32xf32>
    %c0_3 = arith.constant 0 : index
    %c0_4 = arith.constant 0 : index
    %3 = vector.load %arg3[%c0_3, %c0_4] : memref<1x32xf32, #tpu.memory_space<vmem>>, vector<1x32xf32>
    %4 = vector.broadcast %3 : vector<1x32xf32> to vector<8x32xf32>
    %5 = arith.addf %2, %4 : vector<8x32xf32>
    %cst_5 = arith.constant 0.000000e+00 : f32
    %6 = vector.broadcast %cst_5 : f32 to vector<8x32xf32>
    %7 = arith.maximumf %5, %6 : vector<8x32xf32>
    %c0_i32 = arith.constant 0 : i32
    %8 = arith.index_cast %c0_i32 : i32 to index
    %c0_6 = arith.constant 0 : index
    %c0_7 = arith.constant 0 : index
    %9 = vector.load %arg4[%8, %c0_6, %c0_7] : memref<2x32x32xf32, #tpu.memory_space<vmem>>, vector<1x32x32xf32>
    %10 = vector.shape_cast %9 : vector<1x32x32xf32> to vector<32x32xf32>
    %11 = arith.index_cast %c0_i32 : i32 to index
    %c0_8 = arith.constant 0 : index
    %c0_9 = arith.constant 0 : index
    %12 = vector.load %arg5[%11, %c0_8, %c0_9] : memref<2x1x32xf32, #tpu.memory_space<vmem>>, vector<1x1x32xf32>
    %13 = vector.shape_cast %12 : vector<1x1x32xf32> to vector<1x32xf32>
    %cst_10 = arith.constant dense<0.000000e+00> : vector<8x32xf32>
    %14 = tpu.matmul %7, %10, %cst_10 {dimension_numbers = #tpu.dot_dimension_numbers<[1], [0], [0], [1], [0, 0, 1, 1], [], []>} : vector<8x32xf32>, vector<32x32xf32>, vector<8x32xf32> -> vector<8x32xf32>
    %15 = vector.broadcast %13 : vector<1x32xf32> to vector<8x32xf32>
    %16 = arith.addf %14, %15 : vector<8x32xf32>
    %cst_11 = arith.constant 0.000000e+00 : f32
    %17 = vector.broadcast %cst_11 : f32 to vector<8x32xf32>
    %18 = arith.maximumf %16, %17 : vector<8x32xf32>
    %c1_i32 = arith.constant 1 : i32
    %19 = arith.index_cast %c1_i32 : i32 to index
    %c0_12 = arith.constant 0 : index
    %c0_13 = arith.constant 0 : index
    %20 = vector.load %arg4[%19, %c0_12, %c0_13] : memref<2x32x32xf32, #tpu.memory_space<vmem>>, vector<1x32x32xf32>
    %21 = vector.shape_cast %20 : vector<1x32x32xf32> to vector<32x32xf32>
    %22 = arith.index_cast %c1_i32 : i32 to index
    %c0_14 = arith.constant 0 : index
    %c0_15 = arith.constant 0 : index
    %23 = vector.load %arg5[%22, %c0_14, %c0_15] : memref<2x1x32xf32, #tpu.memory_space<vmem>>, vector<1x1x32xf32>
    %24 = vector.shape_cast %23 : vector<1x1x32xf32> to vector<1x32xf32>
    %cst_16 = arith.constant dense<0.000000e+00> : vector<8x32xf32>
    %25 = tpu.matmul %18, %21, %cst_16 {dimension_numbers = #tpu.dot_dimension_numbers<[1], [0], [0], [1], [0, 0, 1, 1], [], []>} : vector<8x32xf32>, vector<32x32xf32>, vector<8x32xf32> -> vector<8x32xf32>
    %26 = vector.broadcast %24 : vector<1x32xf32> to vector<8x32xf32>
    %27 = arith.addf %25, %26 : vector<8x32xf32>
    %cst_17 = arith.constant 0.000000e+00 : f32
    %28 = vector.broadcast %cst_17 : f32 to vector<8x32xf32>
    %29 = arith.maximumf %27, %28 : vector<8x32xf32>
    %c2_i32 = arith.constant 2 : i32
    %c0_18 = arith.constant 0 : index
    %c0_19 = arith.constant 0 : index
    %30 = vector.load %arg6[%c0_18, %c0_19] : memref<32x128xf32, #tpu.memory_space<vmem>>, vector<32x128xf32>
    %cst_20 = arith.constant dense<0.000000e+00> : vector<8x128xf32>
    %31 = tpu.matmul %29, %30, %cst_20 {dimension_numbers = #tpu.dot_dimension_numbers<[1], [0], [0], [1], [0, 0, 1, 1], [], []>} : vector<8x32xf32>, vector<32x128xf32>, vector<8x128xf32> -> vector<8x128xf32>
    %c0_21 = arith.constant 0 : index
    %c0_22 = arith.constant 0 : index
    %32 = vector.load %arg7[%c0_21, %c0_22] : memref<1x128xf32, #tpu.memory_space<vmem>>, vector<1x128xf32>
    %33 = vector.broadcast %32 : vector<1x128xf32> to vector<8x128xf32>
    %34 = arith.addf %31, %33 : vector<8x128xf32>
    %c0_23 = arith.constant 0 : index
    %c0_24 = arith.constant 0 : index
    %35 = vector.load %arg8[%c0_23, %c0_24] : memref<8x128xf32, #tpu.memory_space<vmem>>, vector<8x128xf32>
    tpu.vector_store %arg8[%c0_23, %c0_24], %34 {strides = array<i32>} : memref<8x128xf32, #tpu.memory_space<vmem>>, vector<8x128xf32>,
    return
  }
  func.func @transform_0(%arg0: i32) -> (i32, i32) {
    %c0_i32 = arith.constant 0 : i32
    %c0_i32_0 = arith.constant 0 : i32
    return %arg0, %c0_i32 : i32, i32
  }
  func.func @transform_1(%arg0: i32) -> (i32, i32) {
    %c0_i32 = arith.constant 0 : i32
    %c0_i32_0 = arith.constant 0 : i32
    %c0_i32_1 = arith.constant 0 : i32
    return %c0_i32, %c0_i32_0 : i32, i32
  }
  func.func @transform_2(%arg0: i32) -> (i32, i32) {
    %c0_i32 = arith.constant 0 : i32
    %c0_i32_0 = arith.constant 0 : i32
    %c0_i32_1 = arith.constant 0 : i32
    return %c0_i32, %c0_i32_0 : i32, i32
  }
  func.func @transform_3(%arg0: i32) -> (i32, i32, i32) {
    %c0_i32 = arith.constant 0 : i32
    %c0_i32_0 = arith.constant 0 : i32
    %c0_i32_1 = arith.constant 0 : i32
    %c0_i32_2 = arith.constant 0 : i32
    return %c0_i32, %c0_i32_0, %c0_i32_1 : i32, i32, i32
  }
  func.func @transform_4(%arg0: i32) -> (i32, i32, i32) {
    %c0_i32 = arith.constant 0 : i32
    %c0_i32_0 = arith.constant 0 : i32
    %c0_i32_1 = arith.constant 0 : i32
    %c0_i32_2 = arith.constant 0 : i32
    return %c0_i32, %c0_i32_0, %c0_i32_1 : i32, i32, i32
  }
  func.func @transform_5(%arg0: i32) -> (i32, i32) {
    %c0_i32 = arith.constant 0 : i32
    %c0_i32_0 = arith.constant 0 : i32
    %c0_i32_1 = arith.constant 0 : i32
    return %c0_i32, %c0_i32_0 : i32, i32
  }
  func.func @transform_6(%arg0: i32) -> (i32, i32) {
    %c0_i32 = arith.constant 0 : i32
    %c0_i32_0 = arith.constant 0 : i32
    %c0_i32_1 = arith.constant 0 : i32
    return %c0_i32, %c0_i32_0 : i32, i32
  }
  func.func @transform_7(%arg0: i32) -> (i32, i32) {
    %c0_i32 = arith.constant 0 : i32
    %c0_i32_0 = arith.constant 0 : i32
    return %arg0, %c0_i32 : i32, i32
  }
}

</mosaic_0001>

<bundles_post_ra>
// kernel: torch_model_forward.1
= control target key start
LH: loop header
LB: loop body
LE: loop exit
PB: predicated region body
PF: predicated region fallthrough
CT: control target
= control target key end

     0   :  { %12 = vsyncpa [#allocation3], 0  ;;  %s554_s0 = inlined_call_operand.hbm [shape: f32[8,32], index: 0, kind: input, shape index: {}]   ;;  %s555_s1 = inlined_call_operand.hbm [shape: f32[32,32], index: 1, kind: input, shape index: {}]   ;;  %s556_s2 = inlined_call_operand.hbm [shape: f32[1,32], index: 2, kind: input, shape index: {}]   ;;  %s557_s3 = inlined_call_operand.hbm [shape: f32[2,32,32], index: 3, kind: input, shape index: {}]   ;;  %s558_s4 = inlined_call_operand.hbm [shape: f32[2,1,32], index: 4, kind: input, shape index: {}]   ;;  %s559_s5 = inlined_call_operand.hbm [shape: f32[32,128], index: 5, kind: input, shape index: {}]   ;;  %s560_s6 = inlined_call_operand.vmem [shape: f32[1,128], index: 6, kind: input, shape index: {}]   ;;  %s561_s7 = inlined_call_operand.hbm [shape: f32[8,128], index: 7, kind: output, shape index: {}]  }
   0x1   :  { %13 = vsyncpa [#allocation6], 0 }
   0x2   :  { %14 = vsyncpa [#allocation9], 0 }
   0x3   :  { %15 = vsyncpa [#allocation12], 0  ;;  %s32_s26 = sshll.u32 %s555_s1, 4  ;;  %s33_s26 = int_to_ptr.hbm [resolvable:$true] %s32_s26 }
   0x4   :  { %16 = vsyncpa [#allocation4], 0  ;;  %s466_s27 = smov [#allocation5]   ;;  %s56_s8 = sshll.u32 %s557_s3, 4  ;;  %s57_s8 = int_to_ptr.hbm [resolvable:$true] %s56_s8 }
   0x5   :  { %s34_s28 = sshll.u32 %s466_s27, 4  ;;  %s467_s9 = smov 128   ;;  %s35_s28 = int_to_ptr.vmem [resolvable:$true] %s34_s28 }
   0x6   :  { %s468_s10 = smov 8   ;;  %s469_s11 = smov [#allocation8]  }
   0x7   :  { %40 = dma.hbm_to_vmem [thread:$0]  %s33_s26, 512, %s35_s28, [#allocation6], %s467_s9, %s467_s9, %s468_s10  }
   0x8   :  { %s58_s12 = sshll.u32 %s469_s11, 4  ;;  %s22_s14 = sshll.u32 %s554_s0, 4  ;;  %s59_s12 = int_to_ptr.vmem [resolvable:$true] %s58_s12  ;;  %s23_s14 = int_to_ptr.hbm [resolvable:$true] %s22_s14 }
   0x9   :  { %64 = dma.hbm_to_vmem [thread:$0]  %s57_s8, 1024, %s59_s12, [#allocation9], %s467_s9, %s467_s9, %s468_s10  }
   0xa   :  { %s46_s16 = sshll.u32 %s556_s2, 4  ;;  %s470_s17 = smov [#allocation2]   ;;  %s47_s16 = int_to_ptr.hbm [resolvable:$true] %s46_s16 }
   0xb   :  { %s24_s18 = sshll.u32 %s470_s17, 4  ;;  %s471_s19 = smov [#allocation7]   ;;  %s25_s18 = int_to_ptr.vmem [resolvable:$true] %s24_s18 }
   0xc   :  { %27 = dma.hbm_to_vmem [thread:$0]  %s23_s14, 128, %s25_s18, [#allocation3]  }
   0xd   :  { %s48_s20 = sshll.u32 %s471_s19, 4  ;;  %s69_s0 = sshll.u32 %s558_s4, 4  ;;  %s49_s20 = int_to_ptr.vmem [resolvable:$true] %s48_s20  ;;  %s70_s0 = int_to_ptr.hbm [resolvable:$true] %s69_s0 }
   0xe   :  { %51 = dma.hbm_to_vmem [thread:$0]  %s47_s16, 16, %s49_s20, [#allocation6]  }
   0xf   :  { %s472_s23 = smov [#allocation10]   ;;  %s82_s2 = sshll.u32 %s559_s5, 4  ;;  %s83_s2 = int_to_ptr.hbm [resolvable:$true] %s82_s2 }
  0x10   :  { %s71_s24 = sshll.u32 %s472_s23, 4  ;;  %s473_s27 = smov 16   ;;  %s72_s24 = int_to_ptr.vmem [resolvable:$true] %s71_s24 }
  0x11   :  { %s474_s28 = smov 1   ;;  %s475_s29 = smov [#allocation11]  }
  0x12   :  { %77 = dma.hbm_to_vmem [thread:$0]  %s70_s0, 32, %s72_s24, [#allocation9], %s473_s27, %s473_s27, %s474_s28  }
  0x13   :  { %s84_s30 = sshll.u32 %s475_s29, 4  ;;  %s85_s30 = int_to_ptr.vmem [resolvable:$true] %s84_s30 }
  0x14   :  { %90 = dma.hbm_to_vmem [thread:$0]  %s83_s2, 512, %s85_s30, [#allocation12], %s467_s9, %s467_s9, %s468_s10  }
  0x15   :  { %456 = dma.done.wait [#allocation3], 128  }
  0x16   :  { %457 = vsyncadd [#allocation3], 4294967168 }
  0x17   :  { %458 = dma.done.wait [#allocation6], 528  }
  0x18   :  { %459 = vsyncadd [#allocation6], 4294966768 }
  0x19   :  { %460 = dma.done.wait [#allocation9], 1056  }
  0x1a   :  { %461 = vsyncadd [#allocation9], 4294966240 }
  0x1b   :  { %462 = dma.done.wait [#allocation12], 512  }
  0x1c   :  { %463 = vsyncadd [#allocation12], 4294966784  ;;  %v121_v0 = vld [vmem:[#allocation5 + $0x18] sm:$0xff]  ;;  %v120_v1 = vld [vmem:[#allocation5 + $0x10] sm:$0xff]  ;;  %vm126_vm0 = vcmask 261120   ;;  %s476_s8 = smov [#allocation13]  }
  0x1d   :  { %142 = vmatpush.msra.mxu0 %v121_v0  ;;  %v154_v2 = vld [vmem:[#allocation8 + $0x18] sm:$0xff]  ;;  %v119_v3 = vld [vmem:[#allocation5 + $0x8] sm:$0xff]  ;;  %v153_v6 = vld [vmem:[#allocation8 + $0x10] sm:$0xff]  ;;  %s254_s9 = sshll.u32 %s476_s8, 4  ;;  %s256_s12 = sshll.u32 %s561_s7, 4  ;;  %s255_s9 = int_to_ptr.vmem [resolvable:$true] %s254_s9  ;;  %s257_s12 = int_to_ptr.hbm [resolvable:$true] %s256_s12 }
  0x1e   :  { %174 = vmatpush.msra.mxu1 %v154_v2  ;;  %v118_v4 = vld [vmem:[#allocation5] sm:$0xff]  ;;  %v117_v5 = vld [vmem:[#allocation2] sm:$0xff]  ;;  %v152_v7 = vld [vmem:[#allocation8 + $0x8] sm:$0xff] }
  0x1f   :  { %143 = vmatpush.msra.mxu0 %v120_v1  ;;  %v151_v8 = vld [vmem:[#allocation8] sm:$0xff]  ;;  %v187_v9 = vld [vmem:[#allocation8 + $0x38] sm:$0xff]  ;;  %v186_v14 = vld [vmem:[#allocation8 + $0x30] sm:$0xff] }
  0x20   :  { %175 = vmatpush.msra.mxu1 %v153_v6  ;;  %208 = vmatpush.msra.mxu2 %v187_v9  ;;  %v284_v10 = vld [vmem:[#allocation7] ss:$0 sm:$0xff]  ;;  %v185_v15 = vld [vmem:[#allocation8 + $0x28] sm:$0xff]  ;;  %v184_v16 = vld [vmem:[#allocation8 + $0x20] sm:$0xff] }
  0x21   :  { %144 = vmatpush.msra.mxu0 %v119_v3  ;;  %v220_v17 = vld [vmem:[#allocation11 + $0x18] sm:$0xff]  ;;  %v219_v22 = vld [vmem:[#allocation11 + $0x10] sm:$0xff]  ;;  %v218_v23 = vld [vmem:[#allocation11 + $0x8] sm:$0xff] }
  0x22   :  { %176 = vmatpush.msra.mxu1 %v152_v7  ;;  %209 = vmatpush.msra.mxu2 %v186_v14  ;;  %v285_v18 = vld [vmem:[#allocation10] ss:$0 sm:$0xff]  ;;  %v217_v24 = vld [vmem:[#allocation11] sm:$0xff]  ;;  %v286_v25 = vld [vmem:[#allocation10 + $0x1] ss:$0 sm:$0xff] }
  0x23   :  { %145 = vmatpush.msra.mxu0 %v118_v4  ;;  %240 = vmatpush.msra.mxu3 %v220_v17  ;;  %v287_v29 = vld [vmem:[%s560_s6] ss:$0 sm:$0xff] }
  0x24   :  { %269 = vmatmul.msk.f32.vlgmr.msra.gmra.mxu0 %vm126_vm0, %v117_v5  ;;  %177 = vmatpush.msra.mxu1 %v151_v8 }
  0x25   :  { %210 = vmatpush.msra.mxu2 %v185_v15  ;;  %241 = vmatpush.msra.mxu3 %v219_v22 }
  0x27   :  { %211 = vmatpush.msra.mxu2 %v184_v16  ;;  %242 = vmatpush.msra.mxu3 %v218_v23 }
  0x29   :  { %243 = vmatpush.msra.mxu3 %v217_v24 }
  0xa1   :  { %v147_v11 = vpop.f32.mrf.mxu0 }
  0xa2   :  { %v148_v12 = vadd.f32 %v284_v10, %v147_v11 }
  0xa4   :  { %v150_v13 = vmax.f32 %v148_v12, 0.0 }
  0xa6   :  { %270 = vmatmul.msk.f32.vlgmr.msra.gmra.mxu1 %vm126_vm0, %v150_v13 }
 0x123   :  { %v179_v19 = vpop.f32.mrf.mxu1 }
 0x124   :  { %v180_v20 = vadd.f32 %v285_v18, %v179_v19 }
 0x126   :  { %v182_v21 = vmax.f32 %v180_v20, 0.0 }
 0x128   :  { %271 = vmatmul.msk.f32.vlgmr.msra.gmra.mxu2 %vm126_vm0, %v182_v21 }
 0x1ab   :  { %v213_v26 = vpop.f32.mrf.mxu2 }
 0x1ac   :  { %v214_v27 = vadd.f32 %v286_v25, %v213_v26 }
 0x1ae   :  { %v216_v28 = vmax.f32 %v214_v27, 0.0 }
 0x1b0   :  { %272 = vmatmul.msk.f32.vlgmr.msra.gmra.mxu3 %vm126_vm0, %v216_v28 }
 0x233   :  { %v245_v30 = vpop.f32.mrf.mxu3 }
 0x234   :  { %v246_v31 = vadd.f32 %v287_v29, %v245_v30 }
 0x236   :  { %248 = vst [vmem:[#allocation13] sm:$0xff] %v246_v31 }
 0x237   :  { %259 = dma.vmem_to_hbm [thread:$0]  %s255_s9, 128, %s257_s12, [#allocation4]  }
 0x238   :  { %464 = dma.done.wait [#allocation4], 128  }
 0x239   :  { %465 = vsyncadd [#allocation4], 4294967168 }
 0x23a   :  { %264 = vsyncpa [#allocation3], 1 }
 0x23b   :  { %265 = vsyncpa [#allocation6], 1 }
 0x23c   :  { %266 = vsyncpa [#allocation9], 1 }
 0x23d   :  { %267 = vsyncpa [#allocation12], 1 }
 0x23e   :  { %268 = vsyncpa [#allocation4], 1 }

</bundles_post_ra>
